<compile_context>
chip_gen: v5e
topology: v5e:2x2
jax: 0.10.0
libtpu: 0.0.40
codegen_flags: <defaults>
</compile_context>

<pallas_src>
import functools

import jax
import jax.numpy as jnp
from jax.experimental import pallas as pl
from jax.experimental.pallas import tpu as pltpu


def _zero_kernel(x_ref, o_ref):
    # x.mul(0.0): keep the multiply (not a constant-zero fill) so NaN/Inf
    # inputs propagate to NaN exactly like the PyTorch reference.
    o_ref[...] = x_ref[...] * 0.0


@functools.partial(jax.jit, static_argnames=("stride",))
def zero_op(x_nchw, *, stride=1):
    """Pallas-backed equivalent of Zero(stride).forward(x) for NCHW input."""
    if stride != 1:
        # Strided spatial subsampling (a view in PyTorch) -- layout plumbing
        # done wrapper-side so the kernel sees a lane-dense contiguous tile.
        x_nchw = x_nchw[:, :, ::stride, ::stride]

    N, C, H, W = x_nchw.shape
    R = N * C          # sublane axis
    L = H * W          # lane axis (lane-dense when a multiple of 128)

    x2 = x_nchw.reshape(R, L)

    # Pick a lane tile: split the lane axis into (up to) 2 parallel blocks of
    # a multiple of 128 so v7x's two TensorCores both get work; otherwise fall
    # back to a single full-extent block (full-array blocks are always legal).
    if L % 256 == 0:
        num_blocks, tl = 2, L // 2
    else:
        num_blocks, tl = 1, L

    out2 = pl.pallas_call(
        _zero_kernel,
        out_shape=jax.ShapeDtypeStruct((R, L), x2.dtype),
        grid=(num_blocks,),
        in_specs=[pl.BlockSpec((R, tl), lambda j: (0, j))],
        out_specs=pl.BlockSpec((R, tl), lambda j: (0, j)),
        compiler_params=pltpu.CompilerParams(
            dimension_semantics=("parallel",)),
    )(x2)

    return out2.reshape(N, C, H, W)


if __name__ == "__main__":
    key = jax.random.PRNGKey(0)
    x = jax.random.normal(key, (2, 4, 16, 16), jnp.float32)  # NCHW like PyTorch

    # stride == 1 path
    y1 = jax.block_until_ready(zero_op(x, stride=1))
    assert y1.shape == (2, 4, 16, 16), y1.shape
    assert bool(jnp.array_equal(y1, x * 0.0))

    # stride == 2 path (strided spatial subsample, then mul by 0)
    y2 = jax.block_until_ready(zero_op(x, stride=2))
    assert y2.shape == (2, 4, 8, 8), y2.shape
    assert bool(jnp.array_equal(y2, x[:, :, ::2, ::2] * 0.0))

    assert bool(jnp.all(jnp.isfinite(y1))) and bool(jnp.all(jnp.isfinite(y2)))
    print("KERNEL_OK")
</pallas_src>

<mosaic_0001>
module attributes {stable_mosaic.version = 11 : i64} {
  func.func @_zero_kernel(%arg0: i32, %arg1: memref<8x128xf32, #tpu.memory_space<vmem>>, %arg2: memref<8x128xf32, #tpu.memory_space<vmem>>) attributes {dimension_semantics = [#tpu.dimension_semantics<parallel>], iteration_bounds = array<i64: 2>, scalar_prefetch = 0 : i64, scratch_operands = 0 : i64, tpu.core_type = #tpu.core_type<tc>, window_params = [{transform_indices = @transform_0, window_bounds = array<i64: 8, 128>}, {transform_indices = @transform_1, window_bounds = array<i64: 8, 128>}]} {
    %c0 = arith.constant 0 : index
    %c0_0 = arith.constant 0 : index
    %0 = vector.load %arg1[%c0, %c0_0] : memref<8x128xf32, #tpu.memory_space<vmem>>, vector<8x128xf32>
    %cst = arith.constant 0.000000e+00 : f32
    %1 = vector.broadcast %cst : f32 to vector<8x128xf32>
    %2 = arith.mulf %0, %1 : vector<8x128xf32>
    %c0_1 = arith.constant 0 : index
    %c0_2 = arith.constant 0 : index
    %3 = vector.load %arg2[%c0_1, %c0_2] : memref<8x128xf32, #tpu.memory_space<vmem>>, vector<8x128xf32>
    tpu.vector_store %arg2[%c0_1, %c0_2], %2 {strides = array<i32>} : memref<8x128xf32, #tpu.memory_space<vmem>>, vector<8x128xf32>,
    return
  }
  func.func @transform_0(%arg0: i32) -> (i32, i32) {
    %c0_i32 = arith.constant 0 : i32
    %c0_i32_0 = arith.constant 0 : i32
    return %c0_i32, %arg0 : i32, i32
  }
  func.func @transform_1(%arg0: i32) -> (i32, i32) {
    %c0_i32 = arith.constant 0 : i32
    %c0_i32_0 = arith.constant 0 : i32
    return %c0_i32, %arg0 : i32, i32
  }
}

</mosaic_0001>

<bundles_post_ra>
// kernel: zero_op.1
= control target key start
LH: loop header
LB: loop body
LE: loop exit
PB: predicated region body
PF: predicated region fallthrough
CT: control target
= control target key end

     0   :  { %s189_s6 = smov 0   ;;  %s209_s0 = inlined_call_operand.vmem [shape: f32[8,256], index: 0, kind: input, shape index: {}]   ;;  %s210_s1 = inlined_call_operand.vmem [shape: f32[8,256], index: 1, kind: output, shape index: {}]  }
   0x1 LB: > { %s168_s7 = sadd.s32 4294967295, %s191_s6   ;;  %p172_p0 = scmp.ge.s32.totalorder %s191_s6, 1  ;;  %s191_s6 = sphi %s189_s6, %s11_s6  }
   0x2   : > { %p86_p1 = scmp.lt.s32.totalorder %s191_s6, 3 }
   0x4   : > { %p87_p2 = pnand %p172_p0, %p86_p1 }
   0x5   : > { %p104_p3 = scmp.lt.s32.totalorder (!%p87_p2), %s168_s7, 1 }
   0x6   : > { %90 = sbr.rel (%p87_p2) target bundleno = 18 (0x12), region = 24 }
   0xb   : > { %s212_s7 = smov (!%p104_p3, %s168_s7), 1 }
   0xc   : > { %s173_s8 = sshll.u32 %s212_s7, 3 }
   0xd   : > { %s107_s11 = scalar_lea.vmem %s209_s0, %s173_s8  ;;  %s111_s14 = scalar_lea.vmem %s210_s1, %s173_s8 }
   0xe   : > { %v112_v0 = vld [vmem:[%s107_s11] sm:$0xff] }
   0xf   : > { %v113_v1 = vmul.f32 0.0, %v112_v0 }
  0x11   : > { %114 = vst [vmem:[%s111_s14] sm:$0xff] %v113_v1 }
  0x12 PF: > { %s11_s6 = sadd.s32 1, %s191_s6  }
  0x13   : > { %p8_p4 = scmp.ge.s32.totalorder %s11_s6, 4  }
  0x15   :  { %10 = sbr.rel (!%p8_p4) target bundleno = 1 (0x1), region = 54 }

</bundles_post_ra>
